<compile_context>
chip_gen: v7x
topology: tpu7x:2x2x1
jax: 0.10.0
libtpu: 0.0.40
codegen_flags: <defaults>
</compile_context>

<pallas_src>
import math

import jax
import jax.numpy as jnp
from jax.experimental import pallas as pl
from jax.experimental.pallas import tpu as pltpu


def _pair(v):
    return (v, v) if isinstance(v, int) else tuple(v)


def _ceil_to(v, m):
    return -(-v // m) * m


def _sublanes(dtype):
    # Sublane multiple of the (sublane, 128) VMEM tiling:
    # 8 for 4-byte dtypes, 16 for bf16/fp16, 32 for int8/fp8.
    return max(8, 32 // jnp.dtype(dtype).itemsize)


def _same_pad_amounts(d2, d3, kernel_size, stride):
    # Exact mirror of the PyTorch forward() arithmetic, including its quirk:
    # size()[2] is read as "width", size()[3] as "height"; F.pad then applies
    # (pad_left, pad_right) to the LAST dim and (pad_top, pad_bottom) to dim 2.
    in_width = d2
    in_height = d3
    out_width = math.ceil(float(in_width) / float(stride[0]))
    out_height = math.ceil(float(in_height) / float(stride[1]))
    pad_along_width = (out_width - 1) * stride[0] + kernel_size[0] - in_width
    pad_along_height = (out_height - 1) * stride[1] + kernel_size[1] - in_height
    pad_left = math.floor(pad_along_width / 2)
    pad_top = math.floor(pad_along_height / 2)
    pad_right = pad_along_width - pad_left
    pad_bottom = pad_along_height - pad_top
    return pad_left, pad_right, pad_top, pad_bottom


def _vmem_plan():
    """Per-generation VMEM plan.

    Returns (tile_budget, vmem_limit).  `tile_budget` bounds a single
    (input_tile + output_tile) footprint; the pipeline double-buffers each, so
    2 * tile_budget stays under `vmem_limit`, itself under physical VMEM
    (128 MiB on v5e/v6e/v5p, 64 MiB per TensorCore on v7x).
    """
    cap = 64 * 1024 * 1024
    try:
        cap = int(pltpu.get_tpu_info().vmem_capacity_bytes)
    except Exception:
        pass
    if cap >= 96 * 1024 * 1024:          # v5e / v6e class: 128 MiB physical
        return 44 * 1024 * 1024, 100 * 1024 * 1024
    # v7x (64 MiB physical) or unknown: stay conservative.
    return 20 * 1024 * 1024, 48 * 1024 * 1024


_MIN_FORCED_STEP_BYTES = 1 << 20   # don't force steps smaller than ~1 MiB


def _maybe_force_split(nc, per_nc_bytes):
    """Everything fits in one grid step; decide whether to split anyway.

    Targets >= 4 steps (2 per v7x TensorCore) with an even step count so
    megacore / dual-TC chips can pipeline, but never shrinks a step below
    ~1 MiB so the ~0.35 us/step overhead stays amortized.  Returns the block
    count along the flattened (N*C) axis.
    """
    if nc <= 1:
        return max(nc, 1)
    for target in (4, 2):
        if nc < target:
            continue
        ct = -(-nc // target)
        steps = -(-nc // ct)
        if ct * per_nc_bytes >= _MIN_FORCED_STEP_BYTES and steps % 2 == 0:
            return ct
    return nc


def _flat_h_pad(xf, n, c, hi, wi, h_out, p_t, p_b, dtype,
                tile_budget, vmem_limit, cost):
    """Lane-dense fast path for H-only padding (pad_left == pad_right == 0).

    (H, W) is flattened so the last (lane) dim is hi*wi / h_out*wi wide:
    loads/stores are wide and lane-dense and the VMEM tile has no per-row
    128-lane padding.
    """
    nc = xf.shape[0]
    itemsize = jnp.dtype(dtype).itemsize
    sub = _sublanes(dtype)
    row_bytes = (_ceil_to(hi * wi, 128) + _ceil_to(h_out * wi, 128)) * itemsize

    ct = min(nc, max(1, tile_budget // row_bytes))
    if ct >= nc:
        ct = _maybe_force_split(nc, row_bytes)
    if ct < nc:
        # Keep the blocked second-to-last dim a sublane multiple (safe because
        # sub * row_bytes <= tile_budget was checked by the caller).
        ct = max(sub, (ct // sub) * sub)
    grid = (pl.cdiv(nc, ct),)

    def kernel(x_ref, o_ref):
        # Partial last block (nc % ct != 0): Pallas masks out-of-bounds writes
        # on the leading blocked dim, so full ct-sized stores are safe.
        blk = o_ref.shape[0]
        if p_t:
            o_ref[:, pl.ds(0, p_t * wi)] = jnp.zeros((blk, p_t * wi), dtype)
        if p_b:
            o_ref[:, pl.ds((p_t + hi) * wi, p_b * wi)] = jnp.zeros(
                (blk, p_b * wi), dtype)
        # Interior: one wide, lane-dense store at a static offset.
        o_ref[:, pl.ds(p_t * wi, hi * wi)] = x_ref[...]

    out = pl.pallas_call(
        kernel,
        out_shape=jax.ShapeDtypeStruct((nc, h_out * wi), dtype),
        grid_spec=pltpu.PrefetchScalarGridSpec(
            num_scalar_prefetch=0,
            grid=grid,
            in_specs=[pl.BlockSpec((ct, hi * wi), lambda i: (i, 0))],
            out_specs=pl.BlockSpec((ct, h_out * wi), lambda i: (i, 0)),
        ),
        compiler_params=pltpu.CompilerParams(
            dimension_semantics=("parallel",),
            vmem_limit_bytes=vmem_limit),
        cost_estimate=cost,
    )(xf.reshape(nc, hi * wi))
    return out.reshape(n, c, h_out, wi)


def _banded_pad(xf, n, c, hi, wi, h_out, w_out, pads, per_nc, dtype,
                tile_budget, vmem_limit, cost):
    """General path: full-width band stores over (ct, H, W)-shaped blocks."""
    p_t, p_b, p_l, p_r = pads
    nc = xf.shape[0]

    ct = min(nc, max(1, tile_budget // per_nc))
    if ct >= nc:
        ct = _maybe_force_split(nc, per_nc)
    grid = (pl.cdiv(nc, ct),)

    def kernel(x_ref, o_ref):
        # Partial last block (nc % ct != 0): Pallas masks out-of-bounds writes
        # on the leading blocked dim, so full ct-sized stores are safe.
        blk = o_ref.shape[0]
        # Top / bottom pad rows: one full-width store each.
        if p_t:
            o_ref[:, pl.ds(0, p_t), :] = jnp.zeros((blk, p_t, w_out), dtype)
        if p_b:
            o_ref[:, pl.ds(p_t + hi, p_b), :] = jnp.zeros((blk, p_b, w_out), dtype)
        # Middle band: full-width zero store + interior store.  This replaces
        # the old 1-lane-wide masked L/R column stores with two wide stores;
        # a single fused store (zeros concatenated onto x along the lane dim)
        # would be ideal but unaligned minor-dim concat is not reliably
        # lowered by Mosaic, so we stay with well-supported slice stores.
        if p_l or p_r:
            o_ref[:, pl.ds(p_t, hi), :] = jnp.zeros((blk, hi, w_out), dtype)
        o_ref[:, pl.ds(p_t, hi), pl.ds(p_l, wi)] = x_ref[...]

    out = pl.pallas_call(
        kernel,
        out_shape=jax.ShapeDtypeStruct((nc, h_out, w_out), dtype),
        grid_spec=pltpu.PrefetchScalarGridSpec(
            num_scalar_prefetch=0,
            grid=grid,
            in_specs=[pl.BlockSpec((ct, hi, wi), lambda i: (i, 0, 0))],
            out_specs=pl.BlockSpec((ct, h_out, w_out), lambda i: (i, 0, 0)),
        ),
        compiler_params=pltpu.CompilerParams(
            dimension_semantics=("parallel",),
            vmem_limit_bytes=vmem_limit),
        cost_estimate=cost,
    )(xf)
    return out.reshape(n, c, h_out, w_out)


def _row_tiled_pad(xf, n, c, hi, wi, h_out, w_out, pads, dtype,
                   vmem_limit, cost):
    """Fallback for feature maps too large to stage a (H, W) plane pair in
    VMEM: the grid walks output rows, so blocks are (ctr, 1, W)-shaped and the
    VMEM footprint is independent of H (each (1, W) slab pads its sublane dim
    to 8 — a deliberate layout/VMEM trade for unconditional fit)."""
    p_t, p_b, p_l, p_r = pads
    nc = xf.shape[0]
    itemsize = jnp.dtype(dtype).itemsize
    in_row = 8 * _ceil_to(wi, 128) * itemsize
    out_row = 8 * _ceil_to(w_out, 128) * itemsize
    # Input is triple-buffered (small rows; keeps fast HBM busy, esp. v7x),
    # output double-buffered; leave ~8 MiB of headroom under the limit.
    ctr = max(1, min(nc, (vmem_limit - (8 << 20)) // (3 * in_row + 2 * out_row)))
    grid = (pl.cdiv(nc, ctr), h_out)

    def kernel(x_ref, o_ref):
        blk = o_ref.shape[0]
        r = pl.program_id(1)
        o_ref[...] = jnp.zeros((blk, 1, w_out), dtype)

        @pl.when(jnp.logical_and(r >= p_t, r < p_t + hi))
        def _():
            o_ref[:, :, pl.ds(p_l, wi)] = x_ref[...]

    out = pl.pallas_call(
        kernel,
        out_shape=jax.ShapeDtypeStruct((nc, h_out, w_out), dtype),
        grid_spec=pltpu.PrefetchScalarGridSpec(
            num_scalar_prefetch=0,
            grid=grid,
            in_specs=[pl.BlockSpec(
                (ctr, 1, wi),
                # Clamped input row index: pad rows re-read a valid (ignored)
                # row instead of going out of bounds.
                lambda i, r: (i, jnp.clip(r - p_t, 0, hi - 1), 0),
                pipeline_mode=pl.Buffered(3))],
            out_specs=pl.BlockSpec((ctr, 1, w_out), lambda i, r: (i, r, 0)),
        ),
        compiler_params=pltpu.CompilerParams(
            dimension_semantics=("parallel", "parallel"),
            vmem_limit_bytes=vmem_limit),
        cost_estimate=cost,
    )(xf)
    return out.reshape(n, c, h_out, w_out)


def same_pad_2d(x, kernel_size, stride):
    """TF 'SAME' padding, semantics identical to the PyTorch SamePad2d module.

    x: (N, C, D2, D3).  Returns the F.pad-equivalent result: dim 2 padded by
    (pad_top, pad_bottom), dim 3 by (pad_left, pad_right).  Negative pads
    (kernel < stride) crop, exactly like F.pad.
    """
    kernel_size = _pair(kernel_size)
    stride = _pair(stride)

    n, c, d2, d3 = x.shape
    pad_left, pad_right, pad_top, pad_bottom = _same_pad_amounts(
        d2, d3, kernel_size, stride)

    # F.pad with negative values crops from that side: split each side into a
    # crop (negative part, done in the wrapper) and a pad (positive part).
    crop_t, crop_b = max(0, -pad_top), max(0, -pad_bottom)
    crop_l, crop_r = max(0, -pad_left), max(0, -pad_right)
    p_t, p_b = max(0, pad_top), max(0, pad_bottom)
    p_l, p_r = max(0, pad_left), max(0, pad_right)

    if crop_t or crop_b or crop_l or crop_r:
        x = x[:, :, crop_t: d2 - crop_b, crop_l: d3 - crop_r]

    if (p_t, p_b, p_l, p_r) == (0, 0, 0, 0):
        return x   # nothing to zero-pad; (possibly cropped) input is the answer

    n, c, hi, wi = x.shape
    h_out = hi + p_t + p_b
    w_out = wi + p_l + p_r
    nc = n * c
    dtype = x.dtype
    itemsize = jnp.dtype(dtype).itemsize
    sub = _sublanes(dtype)

    tile_budget, vmem_limit = _vmem_plan()
    cost = pl.CostEstimate(
        flops=0, transcendentals=0,
        bytes_accessed=(nc * hi * wi + nc * h_out * w_out) * itemsize)

    xf = x.reshape(nc, hi, wi)

    if p_l == 0 and p_r == 0:
        # H-only padding: lane-dense flat fast path if one sublane-group of
        # flattened rows fits the budget, else the row-tiled fallback.
        row_bytes = (_ceil_to(hi * wi, 128) + _ceil_to(h_out * wi, 128)) * itemsize
        if sub * row_bytes <= tile_budget:
            return _flat_h_pad(xf, n, c, hi, wi, h_out, p_t, p_b, dtype,
                               tile_budget, vmem_limit, cost)
        return _row_tiled_pad(xf, n, c, hi, wi, h_out, w_out,
                              (p_t, p_b, p_l, p_r), dtype, vmem_limit, cost)

    # General (W and possibly H) padding: true (sublane, 128)-tiled footprint
    # of one input plane + one output plane.
    in_plane = _ceil_to(hi, sub) * _ceil_to(wi, 128) * itemsize
    out_plane = _ceil_to(h_out, sub) * _ceil_to(w_out, 128) * itemsize
    per_nc = in_plane + out_plane
    if per_nc > tile_budget:
        # Even a single plane pair does not fit the budget: tile along H.
        return _row_tiled_pad(xf, n, c, hi, wi, h_out, w_out,
                              (p_t, p_b, p_l, p_r), dtype, vmem_limit, cost)
    return _banded_pad(xf, n, c, hi, wi, h_out, w_out,
                       (p_t, p_b, p_l, p_r), per_nc, dtype,
                       tile_budget, vmem_limit, cost)


if __name__ == "__main__":
    key = jax.random.PRNGKey(0)
    # SamePad2d-style input (N, C, H, W) = (2, 4, 16, 16)
    x = jax.random.normal(key, (2, 4, 16, 16), dtype=jnp.float32)

    # Case 1: kernel=3, stride=1 -> symmetric (1,1)/(1,1) padding (banded path).
    y = jax.block_until_ready(same_pad_2d(x, 3, 1))
    ref = jnp.pad(x, ((0, 0), (0, 0), (1, 1), (1, 1)))
    assert y.shape == ref.shape, (y.shape, ref.shape)
    assert bool(jnp.allclose(y, ref)), "mismatch vs reference padding (k=3,s=1)"

    # Case 2: kernel=3, stride=2 -> asymmetric (0,1)/(0,1) padding (banded path).
    y2 = jax.block_until_ready(same_pad_2d(x, 3, 2))
    ref2 = jnp.pad(x, ((0, 0), (0, 0), (0, 1), (0, 1)))
    assert y2.shape == ref2.shape, (y2.shape, ref2.shape)
    assert bool(jnp.allclose(y2, ref2)), "mismatch vs reference padding (k=3,s=2)"

    # Case 3: kernel=1, stride=4 -> negative pads (F.pad crops); wrapper path.
    y3 = jax.block_until_ready(same_pad_2d(x, 1, 4))
    ref3 = x[:, :, 2:15, 2:15]
    assert y3.shape == ref3.shape, (y3.shape, ref3.shape)
    assert bool(jnp.allclose(y3, ref3)), "mismatch vs reference crop (k=1,s=4)"

    # Case 4: kernel=(1,3), stride=1 -> H-only padding, lane-dense flat path.
    y4 = jax.block_until_ready(same_pad_2d(x, (1, 3), 1))
    ref4 = jnp.pad(x, ((0, 0), (0, 0), (1, 1), (0, 0)))
    assert y4.shape == ref4.shape, (y4.shape, ref4.shape)
    assert bool(jnp.allclose(y4, ref4)), "mismatch vs reference padding (k=(1,3))"

    # Case 5: non-square input regression for the module's width/height quirk
    # (dims 2/3 are read as "width"/"height"; F.pad pads the LAST dim with
    # (pad_left, pad_right)).  For (2,3,10,7), k=3, s=2 the module yields
    # dim2 padded by (1,1) and dim3 by (0,1).
    x5 = jax.random.normal(jax.random.PRNGKey(0), (2, 3, 10, 7), dtype=jnp.float32)
    y5 = jax.block_until_ready(same_pad_2d(x5, 3, 2))
    ref5 = jnp.pad(x5, ((0, 0), (0, 0), (1, 1), (0, 1)))
    assert y5.shape == ref5.shape, (y5.shape, ref5.shape)
    assert bool(jnp.allclose(y5, ref5)), "mismatch vs reference (non-square)"

    print("KERNEL_OK")
</pallas_src>

<mosaic_0001>
module attributes {stable_mosaic.version = 11 : i64} {
  func.func @kernel(%arg0: i32, %arg1: memref<8x16x16xf32, #tpu.memory_space<vmem>>, %arg2: memref<8x18x18xf32, #tpu.memory_space<vmem>>) attributes {dimension_semantics = [#tpu.dimension_semantics<parallel>], iteration_bounds = array<i64: 1>, scalar_prefetch = 0 : i64, scratch_operands = 0 : i64, tpu.core_type = #tpu.core_type<tc>, window_params = [{transform_indices = @transform_0, window_bounds = array<i64: 8, 16, 16>}, {transform_indices = @transform_1, window_bounds = array<i64: 8, 18, 18>}]} {
    %cst = arith.constant 0.000000e+00 : f32
    %0 = vector.broadcast %cst : f32 to vector<8x1x18xf32>
    %c0 = arith.constant 0 : index
    %c0_0 = arith.constant 0 : index
    %c0_1 = arith.constant 0 : index
    %1 = vector.load %arg2[%c0, %c0_0, %c0_1] : memref<8x18x18xf32, #tpu.memory_space<vmem>>, vector<8x1x18xf32>
    tpu.vector_store %arg2[%c0, %c0_0, %c0_1], %0 {strides = array<i32>} : memref<8x18x18xf32, #tpu.memory_space<vmem>>, vector<8x1x18xf32>,
    %cst_2 = arith.constant 0.000000e+00 : f32
    %2 = vector.broadcast %cst_2 : f32 to vector<8x1x18xf32>
    %c0_3 = arith.constant 0 : index
    %c17 = arith.constant 17 : index
    %c0_4 = arith.constant 0 : index
    %3 = vector.load %arg2[%c0_3, %c17, %c0_4] : memref<8x18x18xf32, #tpu.memory_space<vmem>>, vector<8x1x18xf32>
    tpu.vector_store %arg2[%c0_3, %c17, %c0_4], %2 {strides = array<i32>} : memref<8x18x18xf32, #tpu.memory_space<vmem>>, vector<8x1x18xf32>,
    %cst_5 = arith.constant 0.000000e+00 : f32
    %4 = vector.broadcast %cst_5 : f32 to vector<8x16x18xf32>
    %c0_6 = arith.constant 0 : index
    %c1 = arith.constant 1 : index
    %c0_7 = arith.constant 0 : index
    %5 = vector.load %arg2[%c0_6, %c1, %c0_7] : memref<8x18x18xf32, #tpu.memory_space<vmem>>, vector<8x16x18xf32>
    tpu.vector_store %arg2[%c0_6, %c1, %c0_7], %4 {strides = array<i32>} : memref<8x18x18xf32, #tpu.memory_space<vmem>>, vector<8x16x18xf32>,
    %c0_8 = arith.constant 0 : index
    %c0_9 = arith.constant 0 : index
    %c0_10 = arith.constant 0 : index
    %6 = vector.load %arg1[%c0_8, %c0_9, %c0_10] : memref<8x16x16xf32, #tpu.memory_space<vmem>>, vector<8x16x16xf32>
    %c0_11 = arith.constant 0 : index
    %c1_12 = arith.constant 1 : index
    %c1_13 = arith.constant 1 : index
    %7 = vector.load %arg2[%c0_11, %c1_12, %c1_13] : memref<8x18x18xf32, #tpu.memory_space<vmem>>, vector<8x16x16xf32>
    tpu.vector_store %arg2[%c0_11, %c1_12, %c1_13], %6 {strides = array<i32>} : memref<8x18x18xf32, #tpu.memory_space<vmem>>, vector<8x16x16xf32>,
    return
  }
  func.func @transform_0(%arg0: i32) -> (i32, i32, i32) {
    %c0_i32 = arith.constant 0 : i32
    %c0_i32_0 = arith.constant 0 : i32
    %c0_i32_1 = arith.constant 0 : i32
    return %arg0, %c0_i32, %c0_i32_0 : i32, i32, i32
  }
  func.func @transform_1(%arg0: i32) -> (i32, i32, i32) {
    %c0_i32 = arith.constant 0 : i32
    %c0_i32_0 = arith.constant 0 : i32
    %c0_i32_1 = arith.constant 0 : i32
    return %arg0, %c0_i32, %c0_i32_0 : i32, i32, i32
  }
}

</mosaic_0001>

<bundles_post_ra>
// kernel: tpu_custom_call.1
= control target key start
LH: loop header
LB: loop body
LE: loop exit
PB: predicated region body
PF: predicated region fallthrough
CT: control target
= control target key end

     0   :  { %6 = vsyncpa [#allocation3], 0  ;;  %s187_s6 = smov [#allocation2]   ;;  %s406_s0 = inlined_call_operand.hbm [shape: f32[8,16,16], index: 0, kind: input, shape index: {}]   ;;  %s407_s1 = inlined_call_operand.vmem [shape: f32[8,18,18], index: 1, kind: output, shape index: {}]  }
   0x1   :  { %s12_s7 = sshll.u32 %s187_s6, 4  ;;  %s163_s10 = scalar_lea.hbm %s406_s0, 2048  ;;  %s13_s7 = int_to_ptr.vmem [resolvable:$true] %s12_s7 }
   0x2   :  { %p164_p0 = scmp.ne.s32.totalorder %s406_s0, %s163_s10  ;;  %p167_p1 = scmp.lt.u32.totalorder %s163_s10, %s406_s0 }
   0x4   :  { %p169_p2 = pnand %p167_p1, %p164_p0 }
   0x6   :  { %172 = shalt.err (!%p169_p2)
}
   0x7   :  { %s173_s15 = scalar_lea.vmem %s13_s7, 2048  ;;  %p178_p4 = scmp.lt.s32.totalorder %s13_s7, %s13_s7 }
   0x8   :  { %p174_p3 = scmp.ne.s32.totalorder %s13_s7, %s173_s15  ;;  %p179_p5 = scmp.lt.s32.totalorder %s173_s15, %s173_s15 }
   0xa   :  { %p180_p6 = por %p179_p5, %p178_p4 }
   0xc   :  { %p181_p7 = pnand %p180_p6, %p174_p3 }
   0xe   :  { %184 = shalt.err (!%p181_p7)
}
   0xf   :  { %s188_s16 = smov 128   ;;  %s189_s17 = smov 8  }
  0x10   :  { %18 = dma.hbm_to_vmem [thread:$0]  %s406_s0, 2048, %s13_s7, [#allocation3], %s188_s16, %s188_s16, %s189_s17  }
  0x11   :  { %185 = dma.done.wait [#allocation3], 2048  }
  0x12   :  { %186 = vsyncadd [#allocation3], 4294965248  ;;  %vm22_vm0 = vcmask 139264   ;;  %vm39_vm1 = vcmask 146432   ;;  %v190_v0 = vmov 0.0   ;;  %v58_v1 = vld [vmem:[#allocation2 + $0x10] sm:$0xff] }
  0x13   :  { %23 = vst.msk [vmem:[%s407_s1] sm:$0x1] %vm22_vm0, %v190_v0  ;;  %24 = vst.msk [vmem:[%s407_s1 + $0x18] sm:$0x1] %vm22_vm0, %v190_v0  ;;  %v56_v2 = vld [vmem:[#allocation2] sm:$0xff]  ;;  %s191_s24 = smov 1  }
  0x14   :  { %25 = vst.msk [vmem:[%s407_s1 + $0x30] sm:$0x1] %vm22_vm0, %v190_v0  ;;  %26 = vst.msk [vmem:[%s407_s1 + $0x48] sm:$0x1] %vm22_vm0, %v190_v0  ;;  %92 = vrot.lane.b32.xlu1 %v58_v1, %s191_s24  ;;  %88 = vrot.lane.b32.xlu0 %v56_v2, %s191_s24  ;;  %v59_v3 = vld [vmem:[#allocation2 + $0x18] sm:$0xff]  ;;  %v57_v4 = vld [vmem:[#allocation2 + $0x8] sm:$0xff] }
  0x15   :  { %27 = vst.msk [vmem:[%s407_s1 + $0x60] sm:$0x1] %vm22_vm0, %v190_v0  ;;  %28 = vst.msk [vmem:[%s407_s1 + $0x78] sm:$0x1] %vm22_vm0, %v190_v0  ;;  %v61_v5 = vld [vmem:[#allocation2 + $0x28] sm:$0xff]  ;;  %v60_v6 = vld [vmem:[#allocation2 + $0x20] sm:$0xff] }
  0x16   :  { %29 = vst.msk [vmem:[%s407_s1 + $0x90] sm:$0x1] %vm22_vm0, %v190_v0  ;;  %30 = vst.msk [vmem:[%s407_s1 + $0xa8] sm:$0x1] %vm22_vm0, %v190_v0  ;;  %v63_v7 = vld [vmem:[#allocation2 + $0x38] sm:$0xff]  ;;  %v62_v8 = vld [vmem:[#allocation2 + $0x30] sm:$0xff] }
  0x17   :  { %31 = vst.msk [vmem:[%s407_s1 + $0x11] sm:$0x1] %vm22_vm0, %v190_v0  ;;  %32 = vst.msk [vmem:[%s407_s1 + $0x29] sm:$0x1] %vm22_vm0, %v190_v0  ;;  %v65_v9 = vld [vmem:[#allocation2 + $0x48] sm:$0xff]  ;;  %v64_v10 = vld [vmem:[#allocation2 + $0x40] sm:$0xff] }
  0x18   :  { %33 = vst.msk [vmem:[%s407_s1 + $0x41] sm:$0x1] %vm22_vm0, %v190_v0  ;;  %34 = vst.msk [vmem:[%s407_s1 + $0x59] sm:$0x1] %vm22_vm0, %v190_v0  ;;  %94 = vrot.lane.b32.xlu1 %v59_v3, %s191_s24  ;;  %90 = vrot.lane.b32.xlu0 %v57_v4, %s191_s24  ;;  %v67_v11 = vld [vmem:[#allocation2 + $0x58] sm:$0xff]  ;;  %v66_v12 = vld [vmem:[#allocation2 + $0x50] sm:$0xff] }
  0x19   :  { %35 = vst.msk [vmem:[%s407_s1 + $0x71] sm:$0x1] %vm22_vm0, %v190_v0  ;;  %36 = vst.msk [vmem:[%s407_s1 + $0x89] sm:$0x1] %vm22_vm0, %v190_v0  ;;  %v69_v13 = vld [vmem:[#allocation2 + $0x68] sm:$0xff]  ;;  %v68_v14 = vld [vmem:[#allocation2 + $0x60] sm:$0xff] }
  0x1a   :  { %37 = vst.msk [vmem:[%s407_s1 + $0xa1] sm:$0x1] %vm22_vm0, %v190_v0  ;;  %38 = vst.msk [vmem:[%s407_s1 + $0xb9] sm:$0x1] %vm22_vm0, %v190_v0  ;;  %v71_v15 = vld [vmem:[#allocation2 + $0x78] sm:$0xff]  ;;  %v70_v16 = vld [vmem:[#allocation2 + $0x70] sm:$0xff] }
  0x1b   :  { %42 = vst.msk [vmem:[%s407_s1 + $0x19] sm:$0xff] %vm39_vm1, %v190_v0  ;;  %40 = vst.msk [vmem:[%s407_s1 + $0x1] sm:$0xff] %vm39_vm1, %v190_v0  ;;  %vm136_vm2 = vcmask 138248  }
  0x1c   :  { %41 = vst.msk [vmem:[%s407_s1 + $0x9] sm:$0xff] %vm39_vm1, %v190_v0  ;;  %43 = vst.msk [vmem:[%s407_s1 + $0x21] sm:$0xff] %vm39_vm1, %v190_v0  ;;  %98 = vrot.lane.b32.xlu1 %v61_v5, %s191_s24  ;;  %96 = vrot.lane.b32.xlu0 %v60_v6, %s191_s24 }
  0x1d   :  { %44 = vst.msk [vmem:[%s407_s1 + $0x31] sm:$0xff] %vm39_vm1, %v190_v0  ;;  %45 = vst.msk [vmem:[%s407_s1 + $0x39] sm:$0xff] %vm39_vm1, %v190_v0 }
  0x1e   :  { %46 = vst.msk [vmem:[%s407_s1 + $0x49] sm:$0xff] %vm39_vm1, %v190_v0  ;;  %47 = vst.msk [vmem:[%s407_s1 + $0x51] sm:$0xff] %vm39_vm1, %v190_v0 }
  0x1f   :  { %48 = vst.msk [vmem:[%s407_s1 + $0x61] sm:$0xff] %vm39_vm1, %v190_v0  ;;  %49 = vst.msk [vmem:[%s407_s1 + $0x69] sm:$0xff] %vm39_vm1, %v190_v0 }
  0x20   :  { %50 = vst.msk [vmem:[%s407_s1 + $0x79] sm:$0xff] %vm39_vm1, %v190_v0  ;;  %51 = vst.msk [vmem:[%s407_s1 + $0x81] sm:$0xff] %vm39_vm1, %v190_v0  ;;  %102 = vrot.lane.b32.xlu1 %v63_v7, %s191_s24  ;;  %100 = vrot.lane.b32.xlu0 %v62_v8, %s191_s24 }
  0x21   :  { %52 = vst.msk [vmem:[%s407_s1 + $0x91] sm:$0xff] %vm39_vm1, %v190_v0  ;;  %53 = vst.msk [vmem:[%s407_s1 + $0x99] sm:$0xff] %vm39_vm1, %v190_v0 }
  0x22   :  { %54 = vst.msk [vmem:[%s407_s1 + $0xa9] sm:$0xff] %vm39_vm1, %v190_v0  ;;  %55 = vst.msk [vmem:[%s407_s1 + $0xb1] sm:$0xff] %vm39_vm1, %v190_v0 }
  0x24   :  { %106 = vrot.lane.b32.xlu1 %v65_v9, %s191_s24  ;;  %104 = vrot.lane.b32.xlu0 %v64_v10, %s191_s24 }
  0x28   :  { %110 = vrot.lane.b32.xlu1 %v67_v11, %s191_s24  ;;  %108 = vrot.lane.b32.xlu0 %v66_v12, %s191_s24 }
  0x2c   :  { %114 = vrot.lane.b32.xlu1 %v69_v13, %s191_s24  ;;  %112 = vrot.lane.b32.xlu0 %v68_v14, %s191_s24 }
  0x30   :  { %118 = vrot.lane.b32.xlu1 %v71_v15, %s191_s24  ;;  %116 = vrot.lane.b32.xlu0 %v70_v16, %s191_s24 }
  0x86   :  { %v93_v17 = vpop.permute.xlu1 %92  ;;  %v89_v18 = vpop.permute.xlu0 %88 }
  0x87   :  { %139 = vst.msk [vmem:[%s407_s1 + $0x19] sm:$0xff] %vm136_vm2, %v93_v17  ;;  %137 = vst.msk [vmem:[%s407_s1 + $0x1] sm:$0xff] %vm136_vm2, %v89_v18 }
  0x8a   :  { %v95_v19 = vpop.permute.xlu1 %94  ;;  %v91_v20 = vpop.permute.xlu0 %90 }
  0x8b   :  { %140 = vst.msk [vmem:[%s407_s1 + $0x21] sm:$0xff] %vm136_vm2, %v95_v19  ;;  %138 = vst.msk [vmem:[%s407_s1 + $0x9] sm:$0xff] %vm136_vm2, %v91_v20 }
  0x8e   :  { %v99_v21 = vpop.permute.xlu1 %98  ;;  %v97_v22 = vpop.permute.xlu0 %96 }
  0x8f   :  { %142 = vst.msk [vmem:[%s407_s1 + $0x39] sm:$0xff] %vm136_vm2, %v99_v21  ;;  %141 = vst.msk [vmem:[%s407_s1 + $0x31] sm:$0xff] %vm136_vm2, %v97_v22 }
  0x92   :  { %v103_v23 = vpop.permute.xlu1 %102  ;;  %v101_v24 = vpop.permute.xlu0 %100 }
  0x93   :  { %144 = vst.msk [vmem:[%s407_s1 + $0x51] sm:$0xff] %vm136_vm2, %v103_v23  ;;  %143 = vst.msk [vmem:[%s407_s1 + $0x49] sm:$0xff] %vm136_vm2, %v101_v24 }
  0x96   :  { %v107_v25 = vpop.permute.xlu1 %106  ;;  %v105_v26 = vpop.permute.xlu0 %104 }
  0x97   :  { %146 = vst.msk [vmem:[%s407_s1 + $0x69] sm:$0xff] %vm136_vm2, %v107_v25  ;;  %145 = vst.msk [vmem:[%s407_s1 + $0x61] sm:$0xff] %vm136_vm2, %v105_v26 }
  0x9a   :  { %v111_v27 = vpop.permute.xlu1 %110  ;;  %v109_v28 = vpop.permute.xlu0 %108 }
  0x9b   :  { %148 = vst.msk [vmem:[%s407_s1 + $0x81] sm:$0xff] %vm136_vm2, %v111_v27  ;;  %147 = vst.msk [vmem:[%s407_s1 + $0x79] sm:$0xff] %vm136_vm2, %v109_v28 }
  0x9e   :  { %v115_v29 = vpop.permute.xlu1 %114  ;;  %v113_v30 = vpop.permute.xlu0 %112 }
  0x9f   :  { %150 = vst.msk [vmem:[%s407_s1 + $0x99] sm:$0xff] %vm136_vm2, %v115_v29  ;;  %149 = vst.msk [vmem:[%s407_s1 + $0x91] sm:$0xff] %vm136_vm2, %v113_v30 }
  0xa2   :  { %v119_v31 = vpop.permute.xlu1 %118  ;;  %v117_v32 = vpop.permute.xlu0 %116 }
  0xa3   :  { %152 = vst.msk [vmem:[%s407_s1 + $0xb1] sm:$0xff] %vm136_vm2, %v119_v31  ;;  %151 = vst.msk [vmem:[%s407_s1 + $0xa9] sm:$0xff] %vm136_vm2, %v117_v32 }
  0xa4   :  { %157 = vsyncpa [#allocation3], 1 }

</bundles_post_ra>
